<compile_context>
chip_gen: v7x
topology: tpu7x:2x2x1
jax: 0.10.0
libtpu: 0.0.40
codegen_flags: <defaults>
</compile_context>

<pallas_src>
import functools

import jax
import jax.numpy as jnp
from jax.experimental import pallas as pl
from jax.experimental.pallas import tpu as pltpu

BN_EPS = 1e-5
PAD = 128  # lane-dense padding for hidden / output features


def _mlp_kernel(x_ref, w_ref, v_ref, o_ref, *, f_pad, inv_b):
    """Whole forward pass, fully resident in VMEM.

    x_ref: (B, f_pad)      input, feature-padded to a sublane multiple
    w_ref: (3, PAD, PAD)   [w1, w2, wp], each zero-padded (in, out)
    v_ref: (8, PAD)        rows: 0=g1, 1=be1, 2=g2, 3=be2, 4=bp, rest zero
    o_ref: (B, PAD)        padded logits (real outputs in the first n_output lanes)
    """
    x = x_ref[...]

    def hidden_block(h, w, g, be):
        # Linear (hidden bias omitted: exactly cancelled by BN mean subtraction).
        z = jnp.dot(h, w, preferred_element_type=jnp.float32)
        # BatchNorm1d, training-mode batch stats via two independent reductions
        # (shorter serial chain than mean -> center -> square -> reduce).
        s1 = jnp.sum(z, axis=0, keepdims=True)
        s2 = jnp.sum(z * z, axis=0, keepdims=True)
        mean = s1 * inv_b
        var = jnp.maximum(s2 * inv_b - mean * mean, 0.0)  # guard tiny cancellation
        scale = g * jax.lax.rsqrt(var + BN_EPS)           # (1, PAD); 0 on padded lanes
        shift = be - mean * scale                         # (1, PAD); 0 on padded lanes
        # BN affine folded + ReLU: one mul + one add + one max over the tensor.
        return jnp.maximum(z * scale + shift, 0.0)

    # First layer contracts only the real (sublane-aligned) feature rows.
    h = hidden_block(x, w_ref[0, :f_pad, :], v_ref[0:1, :], v_ref[1:2, :])
    h = hidden_block(h, w_ref[1], v_ref[2:3, :], v_ref[3:4, :])

    # Final predict Linear (bias kept).
    o_ref[...] = (jnp.dot(h, w_ref[2], preferred_element_type=jnp.float32)
                  + v_ref[4:5, :]).astype(o_ref.dtype)


def pack_params(params, n_feature, n_hidden, n_output, pad=PAD):
    """Zero-pad and pack per-layer parameters into two lane-dense slabs.

    Padded hidden/output lanes have gamma = beta = bias = weight = 0, so they
    stay exactly 0 through BN/ReLU (do not break this invariant when repacking).
    Call once and keep the slabs resident across forward calls.
    """
    def pad2(w):
        r, c = w.shape
        return jnp.zeros((pad, pad), jnp.float32).at[:r, :c].set(w)

    w_slab = jnp.stack([pad2(params["w1"]),
                        pad2(params["w2"]),
                        pad2(params["wp"])])                       # (3, pad, pad)

    v_slab = jnp.zeros((8, pad), jnp.float32)
    v_slab = v_slab.at[0, :n_hidden].set(params["g1"].reshape(-1))
    v_slab = v_slab.at[1, :n_hidden].set(params["be1"].reshape(-1))
    v_slab = v_slab.at[2, :n_hidden].set(params["g2"].reshape(-1))
    v_slab = v_slab.at[3, :n_hidden].set(params["be2"].reshape(-1))
    v_slab = v_slab.at[4, :n_output].set(params["bp"].reshape(-1))
    return w_slab, v_slab


@functools.partial(jax.jit, static_argnames=("n_output",))
def net_forward(x, w_slab, v_slab, n_output):
    """x: (B, n_feature) float32. Returns (B, n_output) logits."""
    B, F = x.shape
    pad = w_slab.shape[-1]
    assert F <= pad, "n_feature must fit the 128-lane weight slab"

    # Pad features only up to a sublane multiple (no-op when already aligned);
    # under jit this fuses with the caller instead of a separate dispatch.
    f_pad = max(8, ((F + 7) // 8) * 8)
    if f_pad != F:
        x = jnp.pad(x, ((0, 0), (0, f_pad - F)))

    vmem = pl.BlockSpec(memory_space=pltpu.MemorySpace.VMEM)
    kernel = functools.partial(_mlp_kernel, f_pad=f_pad, inv_b=1.0 / B)
    out_pad = pl.pallas_call(
        kernel,
        out_shape=jax.ShapeDtypeStruct((B, pad), jnp.float32),
        in_specs=[vmem, vmem, vmem],
        out_specs=vmem,
    )(x, w_slab, v_slab)
    # Lane-dense (B, 128) result; slice to the real outputs once, fused under jit.
    return out_pad[:, :n_output]


def init_params(key, n_feature, n_hidden, n_output):
    """Deterministic init mirroring torch.nn.Linear defaults
    (uniform +/- 1/sqrt(fan_in)); BatchNorm gamma=1, beta=0.
    Weights stored as (in, out) so the kernel computes x @ W."""
    ks = jax.random.split(key, 6)

    def linear(kw, kb, fan_in, fan_out):
        bound = 1.0 / jnp.sqrt(jnp.float32(fan_in))
        w = jax.random.uniform(kw, (fan_in, fan_out), jnp.float32, -bound, bound)
        b = jax.random.uniform(kb, (1, fan_out), jnp.float32, -bound, bound)
        return w, b

    w1, b1 = linear(ks[0], ks[1], n_feature, n_hidden)
    w2, b2 = linear(ks[2], ks[3], n_hidden, n_hidden)
    wp, bp = linear(ks[4], ks[5], n_hidden, n_output)

    return {
        "w1": w1, "b1": b1,
        "g1": jnp.ones((1, n_hidden), jnp.float32),
        "be1": jnp.zeros((1, n_hidden), jnp.float32),
        "w2": w2, "b2": b2,
        "g2": jnp.ones((1, n_hidden), jnp.float32),
        "be2": jnp.zeros((1, n_hidden), jnp.float32),
        "wp": wp, "bp": bp,
    }


def net_forward_ref(x, p):
    """Pure-JAX reference with the original (un-optimized) semantics,
    including the hidden-layer Linear biases and direct variance formula."""
    def block(h, w, b, g, be):
        z = h @ w + b
        mean = jnp.mean(z, axis=0, keepdims=True)
        var = jnp.mean((z - mean) ** 2, axis=0, keepdims=True)
        zn = (z - mean) * jax.lax.rsqrt(var + BN_EPS) * g + be
        return jnp.maximum(zn, 0.0)

    h = block(x, p["w1"], p["b1"], p["g1"], p["be1"])
    h = block(h, p["w2"], p["b2"], p["g2"], p["be2"])
    return h @ p["wp"] + p["bp"]


if __name__ == "__main__":
    # Small shapes consistent with the module spec (n_hidden = 15, m = 2).
    batch = 8
    n_feature = 16
    n_hidden = 15
    n_output = 2

    key = jax.random.PRNGKey(0)
    kx, kp = jax.random.split(key)
    x = jax.random.normal(kx, (batch, n_feature), jnp.float32)
    params = init_params(kp, n_feature, n_hidden, n_output)
    # Pack once; slabs stay resident / reusable across forward calls.
    w_slab, v_slab = pack_params(params, n_feature, n_hidden, n_output)

    out = net_forward(x, w_slab, v_slab, n_output)
    out = jax.block_until_ready(out)

    ref = net_forward_ref(x, params)
    assert out.shape == (batch, n_output)
    assert jnp.allclose(out, ref, atol=1e-4, rtol=1e-4), "mismatch vs JAX reference"

    print("KERNEL_OK")
</pallas_src>

<mosaic_0001>
module attributes {stable_mosaic.version = 11 : i64} {
  func.func @_mlp_kernel(%arg0: memref<8x16xf32, #tpu.memory_space<vmem>>, %arg1: memref<3x128x128xf32, #tpu.memory_space<vmem>>, %arg2: memref<8x128xf32, #tpu.memory_space<vmem>>, %arg3: memref<8x128xf32, #tpu.memory_space<vmem>>) attributes {dimension_semantics = [], scalar_prefetch = 0 : i64, scratch_operands = 0 : i64, tpu.core_type = #tpu.core_type<tc>} {
    %c0 = arith.constant 0 : index
    %c0_0 = arith.constant 0 : index
    %0 = vector.load %arg0[%c0, %c0_0] : memref<8x16xf32, #tpu.memory_space<vmem>>, vector<8x16xf32>
    %c0_1 = arith.constant 0 : index
    %c0_2 = arith.constant 0 : index
    %c0_3 = arith.constant 0 : index
    %1 = vector.load %arg1[%c0_1, %c0_2, %c0_3] : memref<3x128x128xf32, #tpu.memory_space<vmem>>, vector<1x16x128xf32>
    %2 = vector.shape_cast %1 : vector<1x16x128xf32> to vector<16x128xf32>
    %c0_4 = arith.constant 0 : index
    %c0_5 = arith.constant 0 : index
    %3 = vector.load %arg2[%c0_4, %c0_5] : memref<8x128xf32, #tpu.memory_space<vmem>>, vector<1x128xf32>
    %c1 = arith.constant 1 : index
    %c0_6 = arith.constant 0 : index
    %4 = vector.load %arg2[%c1, %c0_6] : memref<8x128xf32, #tpu.memory_space<vmem>>, vector<1x128xf32>
    %cst = arith.constant dense<0.000000e+00> : vector<8x128xf32>
    %5 = tpu.matmul %0, %2, %cst {dimension_numbers = #tpu.dot_dimension_numbers<[1], [0], [0], [1], [0, 0, 1, 1], [], []>} : vector<8x16xf32>, vector<16x128xf32>, vector<8x128xf32> -> vector<8x128xf32>
    %cst_7 = arith.constant dense<0.000000e+00> : vector<128xf32>
    %6 = vector.multi_reduction <add>, %5, %cst_7 [0] : vector<8x128xf32> to vector<128xf32>
    %7 = vector.shape_cast %6 : vector<128xf32> to vector<1x128xf32>
    %8 = arith.mulf %5, %5 : vector<8x128xf32>
    %cst_8 = arith.constant dense<0.000000e+00> : vector<128xf32>
    %9 = vector.multi_reduction <add>, %8, %cst_8 [0] : vector<8x128xf32> to vector<128xf32>
    %10 = vector.shape_cast %9 : vector<128xf32> to vector<1x128xf32>
    %cst_9 = arith.constant 1.250000e-01 : f32
    %11 = vector.broadcast %cst_9 : f32 to vector<1x128xf32>
    %12 = arith.mulf %7, %11 : vector<1x128xf32>
    %cst_10 = arith.constant 1.250000e-01 : f32
    %13 = vector.broadcast %cst_10 : f32 to vector<1x128xf32>
    %14 = arith.mulf %10, %13 : vector<1x128xf32>
    %15 = arith.mulf %12, %12 : vector<1x128xf32>
    %16 = arith.subf %14, %15 : vector<1x128xf32>
    %cst_11 = arith.constant 0.000000e+00 : f32
    %17 = vector.broadcast %cst_11 : f32 to vector<1x128xf32>
    %18 = arith.maximumf %16, %17 : vector<1x128xf32>
    %cst_12 = arith.constant 9.99999974E-6 : f32
    %19 = vector.broadcast %cst_12 : f32 to vector<1x128xf32>
    %20 = arith.addf %18, %19 : vector<1x128xf32>
    %21 = math.rsqrt %20 : vector<1x128xf32>
    %22 = arith.mulf %3, %21 : vector<1x128xf32>
    %23 = arith.mulf %12, %22 : vector<1x128xf32>
    %24 = arith.subf %4, %23 : vector<1x128xf32>
    %25 = vector.broadcast %22 : vector<1x128xf32> to vector<8x128xf32>
    %26 = arith.mulf %5, %25 : vector<8x128xf32>
    %27 = vector.broadcast %24 : vector<1x128xf32> to vector<8x128xf32>
    %28 = arith.addf %26, %27 : vector<8x128xf32>
    %cst_13 = arith.constant 0.000000e+00 : f32
    %29 = vector.broadcast %cst_13 : f32 to vector<8x128xf32>
    %30 = arith.maximumf %28, %29 : vector<8x128xf32>
    %c1_14 = arith.constant 1 : index
    %c0_15 = arith.constant 0 : index
    %c0_16 = arith.constant 0 : index
    %31 = vector.load %arg1[%c1_14, %c0_15, %c0_16] : memref<3x128x128xf32, #tpu.memory_space<vmem>>, vector<1x128x128xf32>
    %32 = vector.shape_cast %31 : vector<1x128x128xf32> to vector<128x128xf32>
    %c2 = arith.constant 2 : index
    %c0_17 = arith.constant 0 : index
    %33 = vector.load %arg2[%c2, %c0_17] : memref<8x128xf32, #tpu.memory_space<vmem>>, vector<1x128xf32>
    %c3 = arith.constant 3 : index
    %c0_18 = arith.constant 0 : index
    %34 = vector.load %arg2[%c3, %c0_18] : memref<8x128xf32, #tpu.memory_space<vmem>>, vector<1x128xf32>
    %cst_19 = arith.constant dense<0.000000e+00> : vector<8x128xf32>
    %35 = tpu.matmul %30, %32, %cst_19 {dimension_numbers = #tpu.dot_dimension_numbers<[1], [0], [0], [1], [0, 0, 1, 1], [], []>} : vector<8x128xf32>, vector<128x128xf32>, vector<8x128xf32> -> vector<8x128xf32>
    %cst_20 = arith.constant dense<0.000000e+00> : vector<128xf32>
    %36 = vector.multi_reduction <add>, %35, %cst_20 [0] : vector<8x128xf32> to vector<128xf32>
    %37 = vector.shape_cast %36 : vector<128xf32> to vector<1x128xf32>
    %38 = arith.mulf %35, %35 : vector<8x128xf32>
    %cst_21 = arith.constant dense<0.000000e+00> : vector<128xf32>
    %39 = vector.multi_reduction <add>, %38, %cst_21 [0] : vector<8x128xf32> to vector<128xf32>
    %40 = vector.shape_cast %39 : vector<128xf32> to vector<1x128xf32>
    %cst_22 = arith.constant 1.250000e-01 : f32
    %41 = vector.broadcast %cst_22 : f32 to vector<1x128xf32>
    %42 = arith.mulf %37, %41 : vector<1x128xf32>
    %cst_23 = arith.constant 1.250000e-01 : f32
    %43 = vector.broadcast %cst_23 : f32 to vector<1x128xf32>
    %44 = arith.mulf %40, %43 : vector<1x128xf32>
    %45 = arith.mulf %42, %42 : vector<1x128xf32>
    %46 = arith.subf %44, %45 : vector<1x128xf32>
    %cst_24 = arith.constant 0.000000e+00 : f32
    %47 = vector.broadcast %cst_24 : f32 to vector<1x128xf32>
    %48 = arith.maximumf %46, %47 : vector<1x128xf32>
    %cst_25 = arith.constant 9.99999974E-6 : f32
    %49 = vector.broadcast %cst_25 : f32 to vector<1x128xf32>
    %50 = arith.addf %48, %49 : vector<1x128xf32>
    %51 = math.rsqrt %50 : vector<1x128xf32>
    %52 = arith.mulf %33, %51 : vector<1x128xf32>
    %53 = arith.mulf %42, %52 : vector<1x128xf32>
    %54 = arith.subf %34, %53 : vector<1x128xf32>
    %55 = vector.broadcast %52 : vector<1x128xf32> to vector<8x128xf32>
    %56 = arith.mulf %35, %55 : vector<8x128xf32>
    %57 = vector.broadcast %54 : vector<1x128xf32> to vector<8x128xf32>
    %58 = arith.addf %56, %57 : vector<8x128xf32>
    %cst_26 = arith.constant 0.000000e+00 : f32
    %59 = vector.broadcast %cst_26 : f32 to vector<8x128xf32>
    %60 = arith.maximumf %58, %59 : vector<8x128xf32>
    %c2_27 = arith.constant 2 : index
    %c0_28 = arith.constant 0 : index
    %c0_29 = arith.constant 0 : index
    %61 = vector.load %arg1[%c2_27, %c0_28, %c0_29] : memref<3x128x128xf32, #tpu.memory_space<vmem>>, vector<1x128x128xf32>
    %62 = vector.shape_cast %61 : vector<1x128x128xf32> to vector<128x128xf32>
    %cst_30 = arith.constant dense<0.000000e+00> : vector<8x128xf32>
    %63 = tpu.matmul %60, %62, %cst_30 {dimension_numbers = #tpu.dot_dimension_numbers<[1], [0], [0], [1], [0, 0, 1, 1], [], []>} : vector<8x128xf32>, vector<128x128xf32>, vector<8x128xf32> -> vector<8x128xf32>
    %c4 = arith.constant 4 : index
    %c0_31 = arith.constant 0 : index
    %64 = vector.load %arg2[%c4, %c0_31] : memref<8x128xf32, #tpu.memory_space<vmem>>, vector<1x128xf32>
    %65 = vector.broadcast %64 : vector<1x128xf32> to vector<8x128xf32>
    %66 = arith.addf %63, %65 : vector<8x128xf32>
    %c0_32 = arith.constant 0 : index
    %c0_33 = arith.constant 0 : index
    %67 = vector.load %arg3[%c0_32, %c0_33] : memref<8x128xf32, #tpu.memory_space<vmem>>, vector<8x128xf32>
    tpu.vector_store %arg3[%c0_32, %c0_33], %66 {strides = array<i32>} : memref<8x128xf32, #tpu.memory_space<vmem>>, vector<8x128xf32>,
    return
  }
}

</mosaic_0001>

<bundles_post_ra>
// kernel: net_forward.1
= control target key start
LH: loop header
LB: loop body
LE: loop exit
PB: predicated region body
PF: predicated region fallthrough
CT: control target
= control target key end

     0   :  { %8 = vsyncpa [#allocation3], 0  ;;  %s725_s0 = inlined_call_operand.hbm [shape: f32[8,16], index: 0, kind: input, shape index: {}]   ;;  %s726_s1 = inlined_call_operand.hbm [shape: f32[3,128,128], index: 1, kind: input, shape index: {}]   ;;  %s727_s2 = inlined_call_operand.hbm [shape: f32[8,128], index: 2, kind: input, shape index: {}]   ;;  %s728_s3 = inlined_call_operand.vmem [shape: f32[8,128], index: 3, kind: output, shape index: {}]  }
   0x1   :  { %9 = vsyncpa [#allocation5], 0  ;;  %s635_s12 = smov [#allocation4]   ;;  %s565_s16 = scalar_lea.hbm %s726_s1, 6144 }
   0x2   :  { %s25_s13 = sshll.u32 %s635_s12, 4  ;;  %p566_p0 = scmp.ne.s32.totalorder %s726_s1, %s565_s16  ;;  %s26_s13 = int_to_ptr.vmem [resolvable:$true] %s25_s13 }
   0x3   :  { %p569_p1 = scmp.lt.u32.totalorder %s565_s16, %s726_s1 }
   0x5   :  { %p571_p2 = pnand %p569_p1, %p566_p0 }
   0x7   :  { %574 = shalt.err (!%p571_p2)
}
   0x8   :  { %s575_s21 = scalar_lea.vmem %s26_s13, 6144  ;;  %p580_p4 = scmp.lt.s32.totalorder %s26_s13, %s26_s13 }
   0x9   :  { %p576_p3 = scmp.ne.s32.totalorder %s26_s13, %s575_s21  ;;  %p581_p5 = scmp.lt.s32.totalorder %s575_s21, %s575_s21 }
   0xb   :  { %p582_p6 = por %p581_p5, %p580_p4 }
   0xd   :  { %p583_p7 = pnand %p582_p6, %p576_p3 }
   0xf   :  { %586 = shalt.err (!%p583_p7)
}
  0x10   :  { %s636_s22 = smov 128   ;;  %s637_s23 = smov 8  }
  0x11   :  { %31 = dma.hbm_to_vmem [thread:$0]  %s726_s1, 6144, %s26_s13, [#allocation5], %s636_s22, %s636_s22, %s637_s23  }
  0x12   :  { %s638_s26 = smov [#allocation2]   ;;  %s639_s28 = smov [#allocation6]  }
  0x13   :  { %s16_s27 = sshll.u32 %s638_s26, 4  ;;  %s38_s29 = sshll.u32 %s639_s28, 4  ;;  %s17_s27 = int_to_ptr.vmem [resolvable:$true] %s16_s27  ;;  %s39_s29 = int_to_ptr.vmem [resolvable:$true] %s38_s29 }
  0x14   :  { %s587_s5 = scalar_lea.hbm %s725_s0, 128 }
  0x15   :  { %p588_p8 = scmp.ne.s32.totalorder %s725_s0, %s587_s5  ;;  %p591_p9 = scmp.lt.u32.totalorder %s587_s5, %s725_s0 }
  0x17   :  { %p593_p10 = pnand %p591_p9, %p588_p8 }
  0x19   :  { %596 = shalt.err (!%p593_p10)
}
  0x1a   :  { %s597_s1 = scalar_lea.vmem %s17_s27, 128  ;;  %p602_p12 = scmp.lt.s32.totalorder %s17_s27, %s17_s27 }
  0x1b   :  { %p598_p11 = scmp.ne.s32.totalorder %s17_s27, %s597_s1  ;;  %p603_p13 = scmp.lt.s32.totalorder %s597_s1, %s597_s1 }
  0x1d   :  { %p604_p0 = por %p603_p13, %p602_p12 }
  0x1f   :  { %p605_p1 = pnand %p604_p0, %p598_p11 }
  0x21   :  { %608 = shalt.err (!%p605_p1)
}
  0x22   :  { %19 = dma.hbm_to_vmem [thread:$0]  %s725_s0, 128, %s17_s27, [#allocation3]  }
  0x23   :  { %s609_s14 = scalar_lea.hbm %s727_s2, 128 }
  0x24   :  { %p610_p2 = scmp.ne.s32.totalorder %s727_s2, %s609_s14  ;;  %p613_p3 = scmp.lt.u32.totalorder %s609_s14, %s727_s2 }
  0x26   :  { %p615_p4 = pnand %p613_p3, %p610_p2 }
  0x28   :  { %618 = shalt.err (!%p615_p4)
}
  0x29   :  { %s619_s19 = scalar_lea.vmem %s39_s29, 128  ;;  %p624_p6 = scmp.lt.s32.totalorder %s39_s29, %s39_s29 }
  0x2a   :  { %p620_p5 = scmp.ne.s32.totalorder %s39_s29, %s619_s19  ;;  %p625_p7 = scmp.lt.s32.totalorder %s619_s19, %s619_s19 }
  0x2c   :  { %p626_p8 = por %p625_p7, %p624_p6 }
  0x2e   :  { %p627_p9 = pnand %p626_p8, %p620_p5 }
  0x30   :  { %630 = shalt.err (!%p627_p9)
}
  0x31   :  { %41 = dma.hbm_to_vmem [thread:$0]  %s727_s2, 128, %s39_s29, [#allocation5]  }
  0x32   :  { %631 = dma.done.wait [#allocation3], 128  }
  0x33   :  { %632 = vsyncadd [#allocation3], 4294967168 }
  0x34   :  { %633 = dma.done.wait [#allocation5], 6272  }
  0x35   :  { %634 = vsyncadd [#allocation5], 4294961024  ;;  %v640_v0 = vmov 0.0|0.0   ;;  %vm641_vm0 = vmmov 0   ;;  %v642_v1 = vmov 0.0   ;;  %v52_v2 = vld [vmem:[#allocation4] sm:$0xff]  ;;  %v153_v51 = vlaneseq }
  0x36   :  { %502 = vmatprep.subr.bf16.mxu0 %v640_v0  ;;  %429 = vmatprep.mubr.msk.f32.mxu0 %vm641_vm0, %v642_v1  ;;  %v53_v3 = vld [vmem:[#allocation4 + $0x8] sm:$0xff]  ;;  %v51_v5 = vld [vmem:[#allocation2] sm:$0xff]  ;;  %vm56_vm1 = vcmask 130048   ;;  %v165_v6 = vld [vmem:[#allocation4 + $0x80] sm:$0xff] }
  0x37   :  { %505 = vmatprep.subr.bf16.mxu1 %v640_v0  ;;  %464 = vmatprep.mubr.msk.f32.mxu1 %vm641_vm0, %v642_v1  ;;  %v503_v4 = vpack.c.bf16 %v53_v3, %v52_v2  ;;  %v166_v7 = vld [vmem:[#allocation4 + $0x88] sm:$0xff]  ;;  %v167_v9 = vld [vmem:[#allocation4 + $0x90] sm:$0xff]  ;;  %v168_v10 = vld [vmem:[#allocation4 + $0x98] sm:$0xff]  ;;  %v154_v52 = vshrl.u32 %v153_v51, 7 }
  0x38   :  { %v506_v8 = vpack.c.bf16 %v166_v7, %v165_v6  ;;  %v509_v11 = vpack.c.bf16 %v168_v10, %v167_v9  ;;  %v169_v12 = vld [vmem:[#allocation4 + $0xa0] sm:$0xff]  ;;  %v170_v13 = vld [vmem:[#allocation4 + $0xa8] sm:$0xff]  ;;  %v171_v15 = vld [vmem:[#allocation4 + $0xb0] sm:$0xff] }
  0x39   :  { %504 = vmatpush3.bf16.msra.mxu0 %v503_v4  ;;  %v512_v14 = vpack.c.bf16 %v170_v13, %v169_v12  ;;  %v172_v16 = vld [vmem:[#allocation4 + $0xb8] sm:$0xff]  ;;  %v173_v18 = vld [vmem:[#allocation4 + $0xc0] sm:$0xff]  ;;  %v174_v19 = vld [vmem:[#allocation4 + $0xc8] sm:$0xff]  ;;  %v709_v54 = vsub.s32 0, %v154_v52 }
  0x3a   :  { %529 = vmatprep.subr.bf16.mxu0 %v640_v0  ;;  %507 = vmatpush3.bf16.msra.mxu1 %v506_v8  ;;  %v515_v17 = vpack.c.bf16 %v172_v16, %v171_v15  ;;  %v518_v20 = vpack.c.bf16 %v174_v19, %v173_v18  ;;  %v175_v21 = vld [vmem:[#allocation4 + $0xd0] sm:$0xff]  ;;  %v176_v22 = vld [vmem:[#allocation4 + $0xd8] sm:$0xff]  ;;  %v177_v24 = vld [vmem:[#allocation4 + $0xe0] sm:$0xff] }
  0x3b   :  { %508 = vmatprep.subr.bf16.mxu1 %v640_v0  ;;  %v521_v23 = vpack.c.bf16 %v176_v22, %v175_v21  ;;  %v178_v25 = vld [vmem:[#allocation4 + $0xe8] sm:$0xff]  ;;  %v179_v27 = vld [vmem:[#allocation4 + $0xf0] sm:$0xff]  ;;  %v180_v28 = vld [vmem:[#allocation4 + $0xf8] sm:$0xff] }
  0x3c   :  { %430 = vmatmul.mubr.msk.f32.vlgmr.msra.gmra.mrb[0].mxu0 %vm56_vm1, %v51_v5  ;;  %v524_v26 = vpack.c.bf16 %v178_v25, %v177_v24  ;;  %v527_v29 = vpack.c.bf16 %v180_v28, %v179_v27  ;;  %v54_v53 = vld [vmem:[#allocation6] sm:$0x1]  ;;  %v55_v57 = vld [vmem:[#allocation6 + $0x1] sm:$0x1]  ;;  %v289_v3 = vld [vmem:[#allocation4 + $0x108] sm:$0xff] }
  0x3d   :  { %499 = vmatprep.mubr.msk.f32.mxu0 %vm641_vm0, %v642_v1  ;;  %v288_v2 = vld [vmem:[#allocation4 + $0x100] sm:$0xff]  ;;  %v290_v5 = vld [vmem:[#allocation4 + $0x110] sm:$0xff]  ;;  %v291_v6 = vld [vmem:[#allocation4 + $0x118] sm:$0xff] }
  0x3e   :  { %510 = vmatpush3.bf16.msra.mxu1 %v509_v11  ;;  %v530_v4 = vpack.c.bf16 %v289_v3, %v288_v2  ;;  %v533_v7 = vpack.c.bf16 %v291_v6, %v290_v5  ;;  %v292_v8 = vld [vmem:[#allocation4 + $0x120] sm:$0xff]  ;;  %v293_v9 = vld [vmem:[#allocation4 + $0x128] sm:$0xff]  ;;  %v294_v11 = vld [vmem:[#allocation4 + $0x130] sm:$0xff] }
  0x3f   :  { %511 = vmatprep.subr.bf16.mxu1 %v640_v0  ;;  %v536_v10 = vpack.c.bf16 %v293_v9, %v292_v8  ;;  %v295_v12 = vld [vmem:[#allocation4 + $0x138] sm:$0xff]  ;;  %v297_v15 = vld [vmem:[#allocation4 + $0x148] sm:$0xff] }
  0x40   :  { %531 = vmatpush3.bf16.msra.mxu0 %v530_v4  ;;  %v539_v13 = vpack.c.bf16 %v295_v12, %v294_v11  ;;  %v299_v18 = vld [vmem:[#allocation4 + $0x158] sm:$0xff]  ;;  %v301_v21 = vld [vmem:[#allocation4 + $0x168] sm:$0xff] }
  0x41   :  { %532 = vmatprep.subr.bf16.mxu0 %v640_v0  ;;  %v303_v24 = vld [vmem:[#allocation4 + $0x178] sm:$0xff] }
  0x42   :  { %513 = vmatpush3.bf16.msra.mxu1 %v512_v14  ;;  %v296_v14 = vld [vmem:[#allocation4 + $0x140] sm:$0xff] }
  0x43   :  { %514 = vmatprep.subr.bf16.mxu1 %v640_v0  ;;  %v542_v16 = vpack.c.bf16 %v297_v15, %v296_v14 }
  0x44   :  { %534 = vmatpush3.bf16.msra.mxu0 %v533_v7 }
  0x45   :  { %535 = vmatprep.subr.bf16.mxu0 %v640_v0 }
  0x46   :  { %516 = vmatpush3.bf16.msra.mxu1 %v515_v17  ;;  %v298_v17 = vld [vmem:[#allocation4 + $0x150] sm:$0xff] }
  0x47   :  { %517 = vmatprep.subr.bf16.mxu1 %v640_v0  ;;  %v545_v19 = vpack.c.bf16 %v299_v18, %v298_v17 }
  0x48   :  { %537 = vmatpush3.bf16.msra.mxu0 %v536_v10 }
  0x49   :  { %538 = vmatprep.subr.bf16.mxu0 %v640_v0 }
  0x4a   :  { %519 = vmatpush3.bf16.msra.mxu1 %v518_v20  ;;  %v300_v20 = vld [vmem:[#allocation4 + $0x160] sm:$0xff] }
  0x4b   :  { %520 = vmatprep.subr.bf16.mxu1 %v640_v0  ;;  %v548_v22 = vpack.c.bf16 %v301_v21, %v300_v20 }
  0x4c   :  { %540 = vmatpush3.bf16.msra.mxu0 %v539_v13 }
  0x4d   :  { %541 = vmatprep.subr.bf16.mxu0 %v640_v0 }
  0x4e   :  { %522 = vmatpush3.bf16.msra.mxu1 %v521_v23  ;;  %v302_v23 = vld [vmem:[#allocation4 + $0x170] sm:$0xff] }
  0x4f   :  { %523 = vmatprep.subr.bf16.mxu1 %v640_v0  ;;  %v551_v25 = vpack.c.bf16 %v303_v24, %v302_v23 }
  0x50   :  { %543 = vmatpush3.bf16.msra.mxu0 %v542_v16 }
  0x51   :  { %544 = vmatprep.subr.bf16.mxu0 %v640_v0 }
  0x52   :  { %525 = vmatpush3.bf16.msra.mxu1 %v524_v26 }
  0x53   :  { %526 = vmatprep.subr.bf16.mxu1 %v640_v0 }
  0x54   :  { %546 = vmatpush3.bf16.msra.mxu0 %v545_v19 }
  0x55   :  { %547 = vmatprep.subr.bf16.mxu0 %v640_v0 }
  0x56   :  { %528 = vmatpush3.bf16.msra.mxu1 %v527_v29 }
  0x58   :  { %549 = vmatpush3.bf16.msra.mxu0 %v548_v22 }
  0x59   :  { %550 = vmatprep.subr.bf16.mxu0 %v640_v0 }
  0x5c   :  { %552 = vmatpush3.bf16.msra.mxu0 %v551_v25 }
 0x10f   :  { %v126_v30 = vpop.f32.mrb[0].mxu0 }
 0x110   :  { %v130_v31 = vrot.slane %v126_v30, 4  ;;  %v136_v32 = vmul.f32 %v126_v30, %v126_v30  ;;  %v431_v33 = vpop.f32.mrb[1].mxu0 }
 0x112   :  { %v131_v34 = vadd.f32 %v130_v31, %v126_v30  ;;  %v137_v35 = vrot.slane %v136_v32, 4 }
 0x114   :  { %v132_v36 = vrot.slane %v131_v34, 2  ;;  %v138_v37 = vadd.f32 %v137_v35, %v136_v32 }
 0x116   :  { %v133_v38 = vadd.f32 %v132_v36, %v131_v34  ;;  %v139_v39 = vrot.slane %v138_v37, 2 }
 0x118   :  { %v134_v40 = vrot.slane %v133_v38, 1  ;;  %v140_v41 = vadd.f32 %v139_v39, %v138_v37 }
 0x11a   :  { %v135_v42 = vadd.f32 %v134_v40, %v133_v38  ;;  %v141_v43 = vrot.slane %v140_v41, 1 }
 0x11c   :  { %v142_v44 = vadd.f32 %v141_v43, %v140_v41  ;;  %v143_v45 = vmul.f32 0.125, %v135_v42 }
 0x11e   :  { %v144_v46 = vmul.f32 0.125, %v142_v44  ;;  %v145_v47 = vmul.f32 %v143_v45, %v143_v45 }
 0x120   :  { %v146_v48 = vsub.f32 %v144_v46, %v145_v47  ;;  %v181_v46 = vld [vmem:[#allocation6 + $0x2] sm:$0x1] }
 0x122   :  { %v147_v49 = vmax.f32 %v146_v48, 0.0 }
 0x124   :  { %v148_v50 = vadd.f32 1e-05, %v147_v49  ;;  %v182_v49 = vld [vmem:[#allocation6 + $0x3] sm:$0x1] }
 0x126   :  { %561 = vrsqrt.f32 %v148_v50 }
 0x130   :  { %v562_v55 = vpop.eup %561 }
 0x131   :  { %v150_v56 = vmul.f32 %v562_v55, %v54_v53 }
 0x133   :  { %v156_v58 = vrot.slane %v150_v56, %v709_v54  ;;  %v151_v59 = vmul.f32 %v150_v56, %v143_v45 }
 0x135   :  { %v152_v60 = vsub.f32 %v55_v57, %v151_v59  ;;  %v157_v61 = vmul.f32 %v156_v58, %v126_v30  ;;  %v387_v58 = vld [vmem:[#allocation6 + $0x4] ss:$0 sm:$0xff] }
 0x137   :  { %v161_v62 = vrot.slane %v152_v60, %v709_v54 }
 0x139   :  { %v162_v63 = vadd.f32 %v161_v62, %v157_v61 }
 0x13b   :  { %v163_v1 = vmax.f32 %v162_v63, 0.0 }
 0x13d   :  { %465 = vmatmul.mubr.f32.vlgmr.msra.gmra.mrb[0].mxu1 %v163_v1 }
 0x210   :  { %v249_v26 = vpop.f32.mrb[0].mxu1 }
 0x211   :  { %v253_v27 = vrot.slane %v249_v26, 4  ;;  %v259_v28 = vmul.f32 %v249_v26, %v249_v26  ;;  %v466_v29 = vpop.f32.mrb[1].mxu1 }
 0x213   :  { %v254_v30 = vadd.f32 %v253_v27, %v249_v26  ;;  %v260_v31 = vrot.slane %v259_v28, 4 }
 0x215   :  { %v255_v32 = vrot.slane %v254_v30, 2  ;;  %v261_v33 = vadd.f32 %v260_v31, %v259_v28 }
 0x217   :  { %v256_v34 = vadd.f32 %v255_v32, %v254_v30  ;;  %v262_v35 = vrot.slane %v261_v33, 2 }
 0x219   :  { %v257_v36 = vrot.slane %v256_v34, 1  ;;  %v263_v37 = vadd.f32 %v262_v35, %v261_v33 }
 0x21b   :  { %v258_v38 = vadd.f32 %v257_v36, %v256_v34  ;;  %v264_v39 = vrot.slane %v263_v37, 1 }
 0x21d   :  { %v265_v40 = vadd.f32 %v264_v39, %v263_v37  ;;  %v266_v0 = vmul.f32 0.125, %v258_v38 }
 0x21f   :  { %v267_v41 = vmul.f32 0.125, %v265_v40  ;;  %v268_v42 = vmul.f32 %v266_v0, %v266_v0 }
 0x221   :  { %v269_v43 = vsub.f32 %v267_v41, %v268_v42 }
 0x223   :  { %v270_v44 = vmax.f32 %v269_v43, 0.0 }
 0x225   :  { %v271_v45 = vadd.f32 1e-05, %v270_v44 }
 0x227   :  { %563 = vrsqrt.f32 %v271_v45 }
 0x231   :  { %v564_v47 = vpop.eup %563 }
 0x232   :  { %v273_v48 = vmul.f32 %v564_v47, %v181_v46 }
 0x234   :  { %v274_v50 = vmul.f32 %v273_v48, %v266_v0  ;;  %v279_v51 = vrot.slane %v273_v48, %v709_v54 }
 0x236   :  { %v275_v52 = vsub.f32 %v182_v49, %v274_v50  ;;  %v280_v53 = vmul.f32 %v279_v51, %v249_v26 }
 0x238   :  { %v284_v55 = vrot.slane %v275_v52, %v709_v54 }
 0x23a   :  { %v285_v56 = vadd.f32 %v284_v55, %v280_v53 }
 0x23c   :  { %v286_v57 = vmax.f32 %v285_v56, 0.0 }
 0x23e   :  { %500 = vmatmul.mubr.f32.vlgmr.msra.gmra.mrb[2].mxu0 %v286_v57 }
 0x311   :  { %v375_v59 = vpop.f32.mrb[2].mxu0 }
 0x312   :  { %v376_v60 = vadd.f32 %v387_v58, %v375_v59  ;;  %v501_v61 = vpop.f32.mrb[3].mxu0 }
 0x314   :  { %379 = vst [vmem:[%s728_s3] sm:$0xff] %v376_v60 }
 0x315   :  { %384 = vsyncpa [#allocation3], 1 }
 0x316   :  { %385 = vsyncpa [#allocation5], 1 }

</bundles_post_ra>
